<compile_context>
chip_gen: v7x
topology: tpu7x:2x2x1
jax: 0.10.0
libtpu: 0.0.40
codegen_flags: <defaults>
</compile_context>

<pallas_src>
from functools import partial

import jax
import jax.numpy as jnp
from jax.experimental import pallas as pl
from jax.experimental.pallas import tpu as pltpu

_LANE = 128
_TB_MAX = 512           # per-grid-step overhead amortizes well by 512 rows
_TB_ALIGN = 16          # full bf16 sublane packing for the x tile


def _round_up(x, m):
    return (x + m - 1) // m * m


def _pad2d(a, rows, cols):
    return jnp.pad(a, ((0, rows - a.shape[0]), (0, cols - a.shape[1])))


def _choose_batch_tiling(batch):
    """Balanced batch tiles: waste < TB rows; >=2 tiles for medium batches so
    a 'parallel' grid axis can shard across both TensorCores on v7x."""
    n_tiles = -(-batch // _TB_MAX)
    if n_tiles == 1 and batch >= 256:
        n_tiles = 2
    tb = _round_up(-(-batch // n_tiles), _TB_ALIGN)
    return n_tiles, tb, n_tiles * tb


# --------------------------------------------------------------------------- #
# Kernel
# --------------------------------------------------------------------------- #
def vae_gaussian_kernel(
    x_ref, eps_ref,
    we_ref, be_ref,        # encoder linear        (bf16 W, f32 b)
    wlat_ref, blat_ref,    # fused latent head     [mu | logvar]
    wd_ref, bd_ref,        # decoder linear
    wout_ref, bout_ref,    # fused output head     [mu | logvar]
    omu_ref, olv_ref,      # outputs: out_mu, out_logvar   [TB, D_out_p] f32
    lmu_ref, llv_ref,      # outputs: latent_mu, latent_lv [TB, D_z_p]  f32
):
    d_zp = eps_ref.shape[-1]
    d_outp = omu_ref.shape[-1]

    # ---- encoder: bf16 MXU inputs, f32 accumulate, f32 elementwise ----
    h = jnp.dot(x_ref[...], we_ref[...],
                preferred_element_type=jnp.float32) + be_ref[...]
    h = jnp.maximum(h, 0.0)                                   # F.relu

    # ---- fused latent heads: one matmul yields [mu | logvar] ----
    lat = jnp.dot(h.astype(jnp.bfloat16), wlat_ref[...],
                  preferred_element_type=jnp.float32) + blat_ref[...]
    lat_mu = lat[:, :d_zp]
    lat_lv = lat[:, d_zp:]

    # Store latent outputs immediately (lane-aligned static slices): frees
    # vregs before the decoder matmuls and overlaps write-back with compute.
    lmu_ref[...] = lat_mu
    llv_ref[...] = lat_lv

    # ---- reparametrize (f32): z = eps * exp(0.5 * logvar) + mu ----
    z = eps_ref[...] * jnp.exp(0.5 * lat_lv) + lat_mu

    # ---- decoder ----
    hd = jnp.dot(z.astype(jnp.bfloat16), wd_ref[...],
                 preferred_element_type=jnp.float32) + bd_ref[...]
    hd = jnp.maximum(hd, 0.0)                                 # F.relu

    # ---- fused output heads ----
    out = jnp.dot(hd.astype(jnp.bfloat16), wout_ref[...],
                  preferred_element_type=jnp.float32) + bout_ref[...]
    omu_ref[...] = out[:, :d_outp]
    olv_ref[...] = out[:, d_outp:]


# --------------------------------------------------------------------------- #
# One-time parameter packing (hoisted out of the per-call forward)
# --------------------------------------------------------------------------- #
def pack_params(params):
    """Pad feature dims to 128 lanes, fuse the two [mu|logvar] head pairs into
    single wide matrices, and cast weights to bf16.  Run ONCE per set of
    weights; the jitted forward consumes the packed dict directly."""
    D_in, D_enc = params["w_enc"].shape
    D_z = params["w_lmu"].shape[1]
    D_dec = params["w_dec"].shape[1]
    D_out = params["w_omu"].shape[1]

    D_in_p, D_enc_p = _round_up(D_in, _LANE), _round_up(D_enc, _LANE)
    D_z_p, D_dec_p = _round_up(D_z, _LANE), _round_up(D_dec, _LANE)
    D_out_p = _round_up(D_out, _LANE)
    bf16 = jnp.bfloat16

    return {
        "w_enc": _pad2d(params["w_enc"], D_in_p, D_enc_p).astype(bf16),
        "b_enc": _pad2d(params["b_enc"], 1, D_enc_p),
        "w_lat": jnp.concatenate(
            [_pad2d(params["w_lmu"], D_enc_p, D_z_p),
             _pad2d(params["w_lvar"], D_enc_p, D_z_p)], axis=1).astype(bf16),
        "b_lat": jnp.concatenate(
            [_pad2d(params["b_lmu"], 1, D_z_p),
             _pad2d(params["b_lvar"], 1, D_z_p)], axis=1),
        "w_dec": _pad2d(params["w_dec"], D_z_p, D_dec_p).astype(bf16),
        "b_dec": _pad2d(params["b_dec"], 1, D_dec_p),
        "w_out": jnp.concatenate(
            [_pad2d(params["w_omu"], D_dec_p, D_out_p),
             _pad2d(params["w_ovar"], D_dec_p, D_out_p)], axis=1).astype(bf16),
        "b_out": jnp.concatenate(
            [_pad2d(params["b_omu"], 1, D_out_p),
             _pad2d(params["b_ovar"], 1, D_out_p)], axis=1),
    }


_WEIGHT_KEYS = ("w_enc", "b_enc", "w_lat", "b_lat",
                "w_dec", "b_dec", "w_out", "b_out")


# --------------------------------------------------------------------------- #
# Forward
# --------------------------------------------------------------------------- #
@partial(jax.jit, static_argnames=("d_out",))
def vae_gaussian_forward(x, eps, packed, *, d_out):
    """x: [B, D_in] f32, eps: [B, D_z] f32, packed: output of pack_params."""
    B = x.shape[0]
    D_z = eps.shape[1]
    D_in_p, D_enc_p = packed["w_enc"].shape
    D_z_p = packed["w_lat"].shape[1] // 2
    D_dec_p = packed["w_dec"].shape[1]
    D_out_p = packed["w_out"].shape[1] // 2

    n_tiles, TB, B_p = _choose_batch_tiling(B)
    f32 = jnp.float32

    # Only per-call activation prep stays in the jitted path.
    x_p = _pad2d(x.astype(f32), B_p, D_in_p).astype(jnp.bfloat16)
    eps_p = _pad2d(eps.astype(f32), B_p, D_z_p)

    inputs = (x_p, eps_p) + tuple(packed[k] for k in _WEIGHT_KEYS)

    def batch_spec(cols):
        return pl.BlockSpec((TB, cols), lambda i: (i, 0))

    def resident_spec(shape):
        # Same block index every grid step -> stays VMEM-resident, no re-DMA.
        return pl.BlockSpec(shape, lambda i: (0, 0))

    in_specs = [batch_spec(D_in_p), batch_spec(D_z_p)] + [
        resident_spec(packed[k].shape) for k in _WEIGHT_KEYS
    ]

    out_shape = (
        jax.ShapeDtypeStruct((B_p, D_out_p), f32),   # out_mu
        jax.ShapeDtypeStruct((B_p, D_out_p), f32),   # out_logvar
        jax.ShapeDtypeStruct((B_p, D_z_p), f32),     # latent_mu
        jax.ShapeDtypeStruct((B_p, D_z_p), f32),     # latent_logvar
    )
    out_specs = [batch_spec(D_out_p), batch_spec(D_out_p),
                 batch_spec(D_z_p), batch_spec(D_z_p)]

    # Advisory cost hint so XLA can overlap this (tiny, mem-bound) call.
    flops = 2 * B_p * (D_in_p * D_enc_p + D_enc_p * 2 * D_z_p
                       + D_z_p * D_dec_p + D_dec_p * 2 * D_out_p)
    bytes_in = sum(int(a.size) * a.dtype.itemsize for a in inputs)
    bytes_out = B_p * (2 * D_out_p + 2 * D_z_p) * 4
    cost = pl.CostEstimate(flops=flops, transcendentals=B_p * D_z_p,
                           bytes_accessed=int(bytes_in + bytes_out))

    # Explicit VMEM budget: 2x (double-buffered) weights + activation/output
    # tiles + headroom, floored at 32 MiB so v5e's 16 MiB scoped default never
    # throttles pipelining; capped at v7x's 64 MiB physical per-TC VMEM.
    weight_bytes = sum(int(packed[k].size) * packed[k].dtype.itemsize
                       for k in _WEIGHT_KEYS)
    tile_bytes = (TB * D_in_p * 2 + TB * D_z_p * 4           # x bf16, eps f32
                  + TB * (2 * D_out_p + 2 * D_z_p) * 4)       # f32 outputs
    vmem_limit = min(max(2 * (weight_bytes + tile_bytes) + (4 << 20),
                         32 << 20), 64 << 20)

    out_mu_p, out_lv_p, lat_mu_p, lat_lv_p = pl.pallas_call(
        vae_gaussian_kernel,
        out_shape=out_shape,
        grid_spec=pltpu.PrefetchScalarGridSpec(
            num_scalar_prefetch=0,
            grid=(n_tiles,),
            in_specs=in_specs,
            out_specs=out_specs,
        ),
        compiler_params=pltpu.CompilerParams(
            dimension_semantics=("parallel",),
            vmem_limit_bytes=int(vmem_limit)),
        cost_estimate=cost,
    )(*inputs)

    # Strip padding (small per-output copies; consumers could also take the
    # padded lane-dense views directly).
    return (out_mu_p[:B, :d_out], out_lv_p[:B, :d_out],
            lat_mu_p[:B, :D_z], lat_lv_p[:B, :D_z])


# --------------------------------------------------------------------------- #
# Init + pure-JAX reference
# --------------------------------------------------------------------------- #
def init_params(key, D_in, D_enc, D_z, D_dec, D_out):
    """Deterministic init mimicking nn.Linear's U(-1/sqrt(fan_in), 1/sqrt(fan_in))."""
    dims = {
        "enc": (D_in, D_enc),
        "lmu": (D_enc, D_z),
        "lvar": (D_enc, D_z),
        "dec": (D_z, D_dec),
        "omu": (D_dec, D_out),
        "ovar": (D_dec, D_out),
    }
    params = {}
    for name, (fan_in, fan_out) in dims.items():
        key, kw, kb = jax.random.split(key, 3)
        bound = 1.0 / jnp.sqrt(jnp.float32(fan_in))
        params[f"w_{name}"] = jax.random.uniform(
            kw, (fan_in, fan_out), jnp.float32, -bound, bound)
        params[f"b_{name}"] = jax.random.uniform(
            kb, (1, fan_out), jnp.float32, -bound, bound)
    return params


def reference_forward(x, eps, p):
    """Pure-JAX reference (mirrors the PyTorch module, with the same bf16 MXU casts)."""
    bf16 = jnp.bfloat16

    def dot(a, w):
        return jnp.dot(a.astype(bf16), w.astype(bf16),
                       preferred_element_type=jnp.float32)

    h = jax.nn.relu(dot(x, p["w_enc"]) + p["b_enc"])
    lat_mu = dot(h, p["w_lmu"]) + p["b_lmu"]
    lat_lv = dot(h, p["w_lvar"]) + p["b_lvar"]
    z = eps * jnp.exp(0.5 * lat_lv) + lat_mu
    hd = jax.nn.relu(dot(z, p["w_dec"]) + p["b_dec"])
    out_mu = dot(hd, p["w_omu"]) + p["b_omu"]
    out_lv = dot(hd, p["w_ovar"]) + p["b_ovar"]
    return out_mu, out_lv, lat_mu, lat_lv


if __name__ == "__main__":
    # Small shapes implied by the module: x is [batch, D_in].
    B, D_in, D_enc, D_z, D_dec, D_out = 8, 32, 64, 16, 64, 32

    key = jax.random.PRNGKey(0)
    key, kx, keps, kp = jax.random.split(key, 4)

    x = jax.random.normal(kx, (B, D_in), jnp.float32)
    eps = jax.random.normal(keps, (B, D_z), jnp.float32)
    params = init_params(kp, D_in, D_enc, D_z, D_dec, D_out)

    packed = pack_params(params)   # one-time weight prep, hoisted out of forward

    outs = jax.block_until_ready(
        vae_gaussian_forward(x, eps, packed, d_out=D_out))
    refs = reference_forward(x, eps, params)

    for got, want in zip(outs, refs):
        assert got.shape == want.shape and got.dtype == want.dtype
        assert jnp.allclose(got, want, atol=1e-2, rtol=1e-2), "mismatch vs reference"

    print("KERNEL_OK")
</pallas_src>

<mosaic_0001>
module attributes {stable_mosaic.version = 11 : i64} {
  func.func @vae_gaussian_kernel(%arg0: i32, %arg1: memref<16x128xbf16, #tpu.memory_space<vmem>>, %arg2: memref<16x128xf32, #tpu.memory_space<vmem>>, %arg3: memref<128x128xbf16, #tpu.memory_space<vmem>>, %arg4: memref<1x128xf32, #tpu.memory_space<vmem>>, %arg5: memref<128x256xbf16, #tpu.memory_space<vmem>>, %arg6: memref<1x256xf32, #tpu.memory_space<vmem>>, %arg7: memref<128x128xbf16, #tpu.memory_space<vmem>>, %arg8: memref<1x128xf32, #tpu.memory_space<vmem>>, %arg9: memref<128x256xbf16, #tpu.memory_space<vmem>>, %arg10: memref<1x256xf32, #tpu.memory_space<vmem>>, %arg11: memref<16x128xf32, #tpu.memory_space<vmem>>, %arg12: memref<16x128xf32, #tpu.memory_space<vmem>>, %arg13: memref<16x128xf32, #tpu.memory_space<vmem>>, %arg14: memref<16x128xf32, #tpu.memory_space<vmem>>) attributes {dimension_semantics = [#tpu.dimension_semantics<parallel>], iteration_bounds = array<i64: 1>, scalar_prefetch = 0 : i64, scratch_operands = 0 : i64, tpu.core_type = #tpu.core_type<tc>, window_params = [{transform_indices = @transform_0, window_bounds = array<i64: 16, 128>}, {transform_indices = @transform_1, window_bounds = array<i64: 16, 128>}, {pipeline_mode = #tpu.pipeline_mode<synchronous>, transform_indices = @transform_2, window_bounds = array<i64: 128, 128>}, {pipeline_mode = #tpu.pipeline_mode<synchronous>, transform_indices = @transform_3, window_bounds = array<i64: 1, 128>}, {pipeline_mode = #tpu.pipeline_mode<synchronous>, transform_indices = @transform_4, window_bounds = array<i64: 128, 256>}, {pipeline_mode = #tpu.pipeline_mode<synchronous>, transform_indices = @transform_5, window_bounds = array<i64: 1, 256>}, {pipeline_mode = #tpu.pipeline_mode<synchronous>, transform_indices = @transform_6, window_bounds = array<i64: 128, 128>}, {pipeline_mode = #tpu.pipeline_mode<synchronous>, transform_indices = @transform_7, window_bounds = array<i64: 1, 128>}, {pipeline_mode = #tpu.pipeline_mode<synchronous>, transform_indices = @transform_8, window_bounds = array<i64: 128, 256>}, {pipeline_mode = #tpu.pipeline_mode<synchronous>, transform_indices = @transform_9, window_bounds = array<i64: 1, 256>}, {transform_indices = @transform_10, window_bounds = array<i64: 16, 128>}, {transform_indices = @transform_11, window_bounds = array<i64: 16, 128>}, {transform_indices = @transform_12, window_bounds = array<i64: 16, 128>}, {transform_indices = @transform_13, window_bounds = array<i64: 16, 128>}]} {
    %c0 = arith.constant 0 : index
    %c0_0 = arith.constant 0 : index
    %0 = vector.load %arg1[%c0, %c0_0] : memref<16x128xbf16, #tpu.memory_space<vmem>>, vector<16x128xbf16>
    %c0_1 = arith.constant 0 : index
    %c0_2 = arith.constant 0 : index
    %1 = vector.load %arg3[%c0_1, %c0_2] : memref<128x128xbf16, #tpu.memory_space<vmem>>, vector<128x128xbf16>
    %cst = arith.constant dense<0.000000e+00> : vector<16x128xf32>
    %2 = tpu.matmul %0, %1, %cst {dimension_numbers = #tpu.dot_dimension_numbers<[1], [0], [0], [1], [0, 0, 1, 1], [], []>} : vector<16x128xbf16>, vector<128x128xbf16>, vector<16x128xf32> -> vector<16x128xf32>
    %c0_3 = arith.constant 0 : index
    %c0_4 = arith.constant 0 : index
    %3 = vector.load %arg4[%c0_3, %c0_4] : memref<1x128xf32, #tpu.memory_space<vmem>>, vector<1x128xf32>
    %4 = vector.broadcast %3 : vector<1x128xf32> to vector<16x128xf32>
    %5 = arith.addf %2, %4 : vector<16x128xf32>
    %cst_5 = arith.constant 0.000000e+00 : f32
    %6 = vector.broadcast %cst_5 : f32 to vector<16x128xf32>
    %7 = arith.maximumf %5, %6 : vector<16x128xf32>
    %8 = arith.truncf %7 : vector<16x128xf32> to vector<16x128xbf16>
    %c0_6 = arith.constant 0 : index
    %c0_7 = arith.constant 0 : index
    %9 = vector.load %arg5[%c0_6, %c0_7] : memref<128x256xbf16, #tpu.memory_space<vmem>>, vector<128x256xbf16>
    %cst_8 = arith.constant dense<0.000000e+00> : vector<16x256xf32>
    %10 = tpu.matmul %8, %9, %cst_8 {dimension_numbers = #tpu.dot_dimension_numbers<[1], [0], [0], [1], [0, 0, 1, 1], [], []>} : vector<16x128xbf16>, vector<128x256xbf16>, vector<16x256xf32> -> vector<16x256xf32>
    %c0_9 = arith.constant 0 : index
    %c0_10 = arith.constant 0 : index
    %11 = vector.load %arg6[%c0_9, %c0_10] : memref<1x256xf32, #tpu.memory_space<vmem>>, vector<1x256xf32>
    %12 = vector.broadcast %11 : vector<1x256xf32> to vector<16x256xf32>
    %13 = arith.addf %10, %12 : vector<16x256xf32>
    %14 = vector.extract_strided_slice %13 {offsets = [0, 0], sizes = [16, 128], strides = [1, 1]} : vector<16x256xf32> to vector<16x128xf32>
    %15 = vector.extract_strided_slice %13 {offsets = [0, 128], sizes = [16, 128], strides = [1, 1]} : vector<16x256xf32> to vector<16x128xf32>
    %c0_11 = arith.constant 0 : index
    %c0_12 = arith.constant 0 : index
    %16 = vector.load %arg13[%c0_11, %c0_12] : memref<16x128xf32, #tpu.memory_space<vmem>>, vector<16x128xf32>
    tpu.vector_store %arg13[%c0_11, %c0_12], %14 {strides = array<i32>} : memref<16x128xf32, #tpu.memory_space<vmem>>, vector<16x128xf32>,
    %c0_13 = arith.constant 0 : index
    %c0_14 = arith.constant 0 : index
    %17 = vector.load %arg14[%c0_13, %c0_14] : memref<16x128xf32, #tpu.memory_space<vmem>>, vector<16x128xf32>
    tpu.vector_store %arg14[%c0_13, %c0_14], %15 {strides = array<i32>} : memref<16x128xf32, #tpu.memory_space<vmem>>, vector<16x128xf32>,
    %c0_15 = arith.constant 0 : index
    %c0_16 = arith.constant 0 : index
    %18 = vector.load %arg2[%c0_15, %c0_16] : memref<16x128xf32, #tpu.memory_space<vmem>>, vector<16x128xf32>
    %cst_17 = arith.constant 5.000000e-01 : f32
    %19 = vector.broadcast %cst_17 : f32 to vector<16x128xf32>
    %20 = arith.mulf %19, %15 : vector<16x128xf32>
    %21 = math.exp %20 : vector<16x128xf32>
    %22 = arith.mulf %18, %21 : vector<16x128xf32>
    %23 = arith.addf %22, %14 : vector<16x128xf32>
    %24 = arith.truncf %23 : vector<16x128xf32> to vector<16x128xbf16>
    %c0_18 = arith.constant 0 : index
    %c0_19 = arith.constant 0 : index
    %25 = vector.load %arg7[%c0_18, %c0_19] : memref<128x128xbf16, #tpu.memory_space<vmem>>, vector<128x128xbf16>
    %cst_20 = arith.constant dense<0.000000e+00> : vector<16x128xf32>
    %26 = tpu.matmul %24, %25, %cst_20 {dimension_numbers = #tpu.dot_dimension_numbers<[1], [0], [0], [1], [0, 0, 1, 1], [], []>} : vector<16x128xbf16>, vector<128x128xbf16>, vector<16x128xf32> -> vector<16x128xf32>
    %c0_21 = arith.constant 0 : index
    %c0_22 = arith.constant 0 : index
    %27 = vector.load %arg8[%c0_21, %c0_22] : memref<1x128xf32, #tpu.memory_space<vmem>>, vector<1x128xf32>
    %28 = vector.broadcast %27 : vector<1x128xf32> to vector<16x128xf32>
    %29 = arith.addf %26, %28 : vector<16x128xf32>
    %cst_23 = arith.constant 0.000000e+00 : f32
    %30 = vector.broadcast %cst_23 : f32 to vector<16x128xf32>
    %31 = arith.maximumf %29, %30 : vector<16x128xf32>
    %32 = arith.truncf %31 : vector<16x128xf32> to vector<16x128xbf16>
    %c0_24 = arith.constant 0 : index
    %c0_25 = arith.constant 0 : index
    %33 = vector.load %arg9[%c0_24, %c0_25] : memref<128x256xbf16, #tpu.memory_space<vmem>>, vector<128x256xbf16>
    %cst_26 = arith.constant dense<0.000000e+00> : vector<16x256xf32>
    %34 = tpu.matmul %32, %33, %cst_26 {dimension_numbers = #tpu.dot_dimension_numbers<[1], [0], [0], [1], [0, 0, 1, 1], [], []>} : vector<16x128xbf16>, vector<128x256xbf16>, vector<16x256xf32> -> vector<16x256xf32>
    %c0_27 = arith.constant 0 : index
    %c0_28 = arith.constant 0 : index
    %35 = vector.load %arg10[%c0_27, %c0_28] : memref<1x256xf32, #tpu.memory_space<vmem>>, vector<1x256xf32>
    %36 = vector.broadcast %35 : vector<1x256xf32> to vector<16x256xf32>
    %37 = arith.addf %34, %36 : vector<16x256xf32>
    %38 = vector.extract_strided_slice %37 {offsets = [0, 0], sizes = [16, 128], strides = [1, 1]} : vector<16x256xf32> to vector<16x128xf32>
    %c0_29 = arith.constant 0 : index
    %c0_30 = arith.constant 0 : index
    %39 = vector.load %arg11[%c0_29, %c0_30] : memref<16x128xf32, #tpu.memory_space<vmem>>, vector<16x128xf32>
    tpu.vector_store %arg11[%c0_29, %c0_30], %38 {strides = array<i32>} : memref<16x128xf32, #tpu.memory_space<vmem>>, vector<16x128xf32>,
    %40 = vector.extract_strided_slice %37 {offsets = [0, 128], sizes = [16, 128], strides = [1, 1]} : vector<16x256xf32> to vector<16x128xf32>
    %c0_31 = arith.constant 0 : index
    %c0_32 = arith.constant 0 : index
    %41 = vector.load %arg12[%c0_31, %c0_32] : memref<16x128xf32, #tpu.memory_space<vmem>>, vector<16x128xf32>
    tpu.vector_store %arg12[%c0_31, %c0_32], %40 {strides = array<i32>} : memref<16x128xf32, #tpu.memory_space<vmem>>, vector<16x128xf32>,
    return
  }
  func.func @transform_0(%arg0: i32) -> (i32, i32) {
    %c0_i32 = arith.constant 0 : i32
    %c0_i32_0 = arith.constant 0 : i32
    return %arg0, %c0_i32 : i32, i32
  }
  func.func @transform_1(%arg0: i32) -> (i32, i32) {
    %c0_i32 = arith.constant 0 : i32
    %c0_i32_0 = arith.constant 0 : i32
    return %arg0, %c0_i32 : i32, i32
  }
  func.func @transform_2(%arg0: i32) -> (i32, i32) {
    %c0_i32 = arith.constant 0 : i32
    %c0_i32_0 = arith.constant 0 : i32
    %c0_i32_1 = arith.constant 0 : i32
    return %c0_i32, %c0_i32_0 : i32, i32
  }
  func.func @transform_3(%arg0: i32) -> (i32, i32) {
    %c0_i32 = arith.constant 0 : i32
    %c0_i32_0 = arith.constant 0 : i32
    %c0_i32_1 = arith.constant 0 : i32
    return %c0_i32, %c0_i32_0 : i32, i32
  }
  func.func @transform_4(%arg0: i32) -> (i32, i32) {
    %c0_i32 = arith.constant 0 : i32
    %c0_i32_0 = arith.constant 0 : i32
    %c0_i32_1 = arith.constant 0 : i32
    return %c0_i32, %c0_i32_0 : i32, i32
  }
  func.func @transform_5(%arg0: i32) -> (i32, i32) {
    %c0_i32 = arith.constant 0 : i32
    %c0_i32_0 = arith.constant 0 : i32
    %c0_i32_1 = arith.constant 0 : i32
    return %c0_i32, %c0_i32_0 : i32, i32
  }
  func.func @transform_6(%arg0: i32) -> (i32, i32) {
    %c0_i32 = arith.constant 0 : i32
    %c0_i32_0 = arith.constant 0 : i32
    %c0_i32_1 = arith.constant 0 : i32
    return %c0_i32, %c0_i32_0 : i32, i32
  }
  func.func @transform_7(%arg0: i32) -> (i32, i32) {
    %c0_i32 = arith.constant 0 : i32
    %c0_i32_0 = arith.constant 0 : i32
    %c0_i32_1 = arith.constant 0 : i32
    return %c0_i32, %c0_i32_0 : i32, i32
  }
  func.func @transform_8(%arg0: i32) -> (i32, i32) {
    %c0_i32 = arith.constant 0 : i32
    %c0_i32_0 = arith.constant 0 : i32
    %c0_i32_1 = arith.constant 0 : i32
    return %c0_i32, %c0_i32_0 : i32, i32
  }
  func.func @transform_9(%arg0: i32) -> (i32, i32) {
    %c0_i32 = arith.constant 0 : i32
    %c0_i32_0 = arith.constant 0 : i32
    %c0_i32_1 = arith.constant 0 : i32
    return %c0_i32, %c0_i32_0 : i32, i32
  }
  func.func @transform_10(%arg0: i32) -> (i32, i32) {
    %c0_i32 = arith.constant 0 : i32
    %c0_i32_0 = arith.constant 0 : i32
    return %arg0, %c0_i32 : i32, i32
  }
  func.func @transform_11(%arg0: i32) -> (i32, i32) {
    %c0_i32 = arith.constant 0 : i32
    %c0_i32_0 = arith.constant 0 : i32
    return %arg0, %c0_i32 : i32, i32
  }
  func.func @transform_12(%arg0: i32) -> (i32, i32) {
    %c0_i32 = arith.constant 0 : i32
    %c0_i32_0 = arith.constant 0 : i32
    return %arg0, %c0_i32 : i32, i32
  }
  func.func @transform_13(%arg0: i32) -> (i32, i32) {
    %c0_i32 = arith.constant 0 : i32
    %c0_i32_0 = arith.constant 0 : i32
    return %arg0, %c0_i32 : i32, i32
  }
}

</mosaic_0001>

<bundles_post_ra>
// kernel: vae_gaussian_forward.1
= control target key start
LH: loop header
LB: loop body
LE: loop exit
PB: predicated region body
PF: predicated region fallthrough
CT: control target
= control target key end

     0   :  { %19 = vsyncpa [#allocation3], 0  ;;  %s1123_s0 = inlined_call_operand.vmem [shape: bf16[16,128], index: 0, kind: input, shape index: {}]   ;;  %s1124_s1 = inlined_call_operand.vmem [shape: f32[16,128], index: 1, kind: input, shape index: {}]   ;;  %s1125_s2 = inlined_call_operand.vmem [shape: bf16[128,128], index: 2, kind: input, shape index: {}]   ;;  %s1126_s3 = inlined_call_operand.vmem [shape: f32[1,128], index: 3, kind: input, shape index: {}]   ;;  %s1127_s4 = inlined_call_operand.hbm [shape: bf16[128,256], index: 4, kind: input, shape index: {}]   ;;  %s1128_s5 = inlined_call_operand.vmem [shape: f32[1,256], index: 5, kind: input, shape index: {}]   ;;  %s1129_s6 = inlined_call_operand.hbm [shape: bf16[128,128], index: 6, kind: input, shape index: {}]   ;;  %s1130_s7 = inlined_call_operand.vmem [shape: f32[1,128], index: 7, kind: input, shape index: {}]   ;;  %s1131_s8 = inlined_call_operand.hbm [shape: bf16[128,256], index: 8, kind: input, shape index: {}]   ;;  %s1132_s9 = inlined_call_operand.vmem [shape: f32[1,256], index: 9, kind: input, shape index: {}]   ;;  %s1133_s10 = inlined_call_operand.vmem [shape: f32[16,128], index: 10, kind: output, shape index: {0}]   ;;  %s1134_s11 = inlined_call_operand.vmem [shape: f32[16,128], index: 11, kind: output, shape index: {1}]   ;;  %s1135_s12 = inlined_call_operand.vmem [shape: f32[16,128], index: 12, kind: output, shape index: {2}]   ;;  %s1136_s13 = inlined_call_operand.vmem [shape: f32[16,128], index: 13, kind: output, shape index: {3}]  }
   0x1   :  { %20 = vsyncpa [#allocation5], 0  ;;  %s918_s25 = smov [#allocation4]   ;;  %s848_s29 = scalar_lea.hbm %s1129_s6, 1024 }
   0x2   :  { %s48_s26 = sshll.u32 %s918_s25, 4  ;;  %p849_p0 = scmp.ne.s32.totalorder %s1129_s6, %s848_s29  ;;  %s49_s26 = int_to_ptr.vmem [resolvable:$true] %s48_s26 }
   0x3   :  { %p852_p1 = scmp.lt.u32.totalorder %s848_s29, %s1129_s6 }
   0x5   :  { %p854_p2 = pnand %p852_p1, %p849_p0 }
   0x7   :  { %857 = shalt.err (!%p854_p2)
}
   0x8   :  { %s858_s17 = scalar_lea.vmem %s49_s26, 1024  ;;  %p863_p4 = scmp.lt.s32.totalorder %s49_s26, %s49_s26 }
   0x9   :  { %p859_p3 = scmp.ne.s32.totalorder %s49_s26, %s858_s17  ;;  %p864_p5 = scmp.lt.s32.totalorder %s858_s17, %s858_s17 }
   0xb   :  { %p865_p6 = por %p864_p5, %p863_p4 }
   0xd   :  { %p866_p7 = pnand %p865_p6, %p859_p3 }
   0xf   :  { %869 = shalt.err (!%p866_p7)
}
  0x10   :  { %s919_s18 = smov 64   ;;  %s920_s19 = smov 4  }
  0x11   :  { %54 = dma.hbm_to_vmem [thread:$0]  %s1129_s6, 1024, %s49_s26, [#allocation5], %s919_s18, %s919_s18, %s920_s19  }
  0x12   :  { %s921_s22 = smov [#allocation2]   ;;  %s870_s27 = scalar_lea.hbm %s1127_s4, 2048 }
  0x13   :  { %s34_s23 = sshll.u32 %s921_s22, 4  ;;  %p871_p8 = scmp.ne.s32.totalorder %s1127_s4, %s870_s27  ;;  %s35_s23 = int_to_ptr.vmem [resolvable:$true] %s34_s23 }
  0x14   :  { %p874_p9 = scmp.lt.u32.totalorder %s870_s27, %s1127_s4 }
  0x16   :  { %p876_p10 = pnand %p874_p9, %p871_p8 }
  0x18   :  { %879 = shalt.err (!%p876_p10)
}
  0x19   :  { %s880_s15 = scalar_lea.vmem %s35_s23, 2048  ;;  %p885_p12 = scmp.lt.s32.totalorder %s35_s23, %s35_s23 }
  0x1a   :  { %p881_p11 = scmp.ne.s32.totalorder %s35_s23, %s880_s15  ;;  %p886_p13 = scmp.lt.s32.totalorder %s880_s15, %s880_s15 }
  0x1c   :  { %p887_p0 = por %p886_p13, %p885_p12 }
  0x1e   :  { %p888_p1 = pnand %p887_p0, %p881_p11 }
  0x20   :  { %891 = shalt.err (!%p888_p1)
}
  0x21   :  { %s922_s6 = smov 128   ;;  %s923_s26 = smov 8  }
  0x22   :  { %40 = dma.hbm_to_vmem [thread:$0]  %s1127_s4, 2048, %s35_s23, [#allocation3], %s922_s6, %s922_s6, %s923_s26  }
  0x23   :  { %s924_s18 = smov [#allocation6]   ;;  %s892_s22 = scalar_lea.hbm %s1131_s8, 2048 }
  0x24   :  { %s62_s19 = sshll.u32 %s924_s18, 4  ;;  %p893_p2 = scmp.ne.s32.totalorder %s1131_s8, %s892_s22  ;;  %s63_s19 = int_to_ptr.vmem [resolvable:$true] %s62_s19 }
  0x25   :  { %p896_p3 = scmp.lt.u32.totalorder %s892_s22, %s1131_s8 }
  0x27   :  { %p898_p4 = pnand %p896_p3, %p893_p2 }
  0x29   :  { %901 = shalt.err (!%p898_p4)
}
  0x2a   :  { %s902_s29 = scalar_lea.vmem %s63_s19, 2048  ;;  %p907_p6 = scmp.lt.s32.totalorder %s63_s19, %s63_s19 }
  0x2b   :  { %p903_p5 = scmp.ne.s32.totalorder %s63_s19, %s902_s29  ;;  %p908_p7 = scmp.lt.s32.totalorder %s902_s29, %s902_s29 }
  0x2d   :  { %p909_p8 = por %p908_p7, %p907_p6 }
  0x2f   :  { %p910_p9 = pnand %p909_p8, %p903_p5 }
  0x31   :  { %913 = shalt.err (!%p910_p9)
}
  0x32   :  { %68 = dma.hbm_to_vmem [thread:$0]  %s1131_s8, 2048, %s63_s19, [#allocation5], %s922_s6, %s922_s6, %s923_s26  }
  0x33   :  { %914 = dma.done.wait [#allocation3], 2048  }
  0x34   :  { %915 = vsyncadd [#allocation3], 4294965248 }
  0x35   :  { %916 = dma.done.wait [#allocation5], 3072  }
  0x36   :  { %917 = vsyncadd [#allocation5], 4294964224  ;;  %v925_v0 = vmov 0.0   ;;  %vm926_vm0 = vmmov 0   ;;  %v779_v1 = vld [vmem:[%s1125_s2] sm:$0xff]   ;;  %v780_v2 = vld [vmem:[%s1125_s2 + $0x8] sm:$0xff]   ;;  %v222_v57 = vlaneseq }
  0x37   :  { %729 = vmatprep.subr.bf16.mxu0 %v925_v0  ;;  %745 = vmatprep.mubr.msk.bf16.mxu0 %vm926_vm0, %v925_v0  ;;  %v781_v3 = vld [vmem:[%s1125_s2 + $0x10] sm:$0xff]   ;;  %v782_v4 = vld [vmem:[%s1125_s2 + $0x18] sm:$0xff]   ;;  %v788_v5 = vld [vmem:[#allocation2 + $0x4] ss:$8 sps:$4 sm:$0xff]   ;;  %v927_v26 = vmov 0  }
  0x38   :  { %730 = vmatpush3.bf16.msra.mxu0 %v779_v1  ;;  %v790_v6 = vld [vmem:[#allocation2] ss:$8 sps:$4 sm:$0xff]   ;;  %312 = vmatprep.subr.bf16.mxu1 %v788_v5  ;;  %v791_v7 = vld [vmem:[#allocation2 + $0x14] ss:$8 sps:$4 sm:$0xff]   ;;  %v793_v8 = vld [vmem:[#allocation2 + $0x10] ss:$8 sps:$4 sm:$0xff]  }
  0x39   :  { %731 = vmatprep.subr.bf16.mxu0 %v925_v0  ;;  %313 = vmatpush1.bf16.msra.mxu1 %v790_v6  ;;  %v794_v9 = vld [vmem:[#allocation2 + $0x24] ss:$8 sps:$4 sm:$0xff]   ;;  %v796_v12 = vld [vmem:[#allocation2 + $0x20] ss:$8 sps:$4 sm:$0xff]   ;;  %v797_v13 = vld [vmem:[#allocation2 + $0x34] ss:$8 sps:$4 sm:$0xff]  }
  0x3a   :  { %314 = vmatprep.subr.bf16.mxu1 %v791_v7  ;;  %v783_v10 = vld [vmem:[%s1125_s2 + $0x20] sm:$0xff]   ;;  %v784_v11 = vld [vmem:[%s1125_s2 + $0x28] sm:$0xff]   ;;  %v799_v14 = vld [vmem:[#allocation2 + $0x30] ss:$8 sps:$4 sm:$0xff]   ;;  %344 = vmatprep.mubr.bf16.mxu1 %v927_v26  ;;  %v223_v58 = vshrl.u32 %v222_v57, 7 }
  0x3b   :  { %v800_v15 = vld [vmem:[#allocation2 + $0x44] ss:$8 sps:$4 sm:$0xff]   ;;  %v785_v16 = vld [vmem:[%s1125_s2 + $0x30] sm:$0xff]   ;;  %v802_v17 = vld [vmem:[#allocation2 + $0x40] ss:$8 sps:$4 sm:$0xff]  }
  0x3c   :  { %732 = vmatpush3.bf16.msra.mxu0 %v780_v2  ;;  %v803_v18 = vld [vmem:[#allocation2 + $0x54] ss:$8 sps:$4 sm:$0xff]   ;;  %v805_v20 = vld [vmem:[#allocation2 + $0x50] ss:$8 sps:$4 sm:$0xff]   ;;  %v787_v21 = vld [vmem:[%s1123_s0] sm:$0xff]   ;;  %v224_v59 = vsub.s32 0, %v223_v58 }
  0x3d   :  { %733 = vmatprep.subr.bf16.mxu0 %v925_v0  ;;  %315 = vmatpush1.bf16.msra.mxu1 %v793_v8  ;;  %v786_v19 = vld [vmem:[%s1125_s2 + $0x38] sm:$0xff]   ;;  %v806_v22 = vld [vmem:[#allocation2 + $0x64] ss:$8 sps:$4 sm:$0xff]   ;;  %v808_v23 = vld [vmem:[#allocation2 + $0x60] ss:$8 sps:$4 sm:$0xff]   ;;  %v228_v61 = vsub.s32 1, %v223_v58 }
  0x3e   :  { %316 = vmatprep.subr.bf16.mxu1 %v794_v9  ;;  %v809_v24 = vld [vmem:[#allocation2 + $0x74] ss:$8 sps:$4 sm:$0xff]   ;;  %v811_v25 = vld [vmem:[#allocation2 + $0x70] ss:$8 sps:$4 sm:$0xff]   ;;  %v812_v27 = vld [vmem:[#allocation4] sm:$0xff]  }
  0x3f   :  { %v660_v28 = vld [vmem:[%s1126_s3] ss:$0 sm:$0xff]  ;;  %v813_v38 = vld [vmem:[#allocation4 + $0x8] sm:$0xff]   ;;  %v814_v39 = vld [vmem:[#allocation4 + $0x10] sm:$0xff]  }
  0x40   :  { %734 = vmatpush3.bf16.msra.mxu0 %v781_v3  ;;  %v815_v40 = vld [vmem:[#allocation4 + $0x18] sm:$0xff]   ;;  %v816_v41 = vld [vmem:[#allocation4 + $0x20] sm:$0xff]   ;;  %v817_v42 = vld [vmem:[#allocation4 + $0x28] sm:$0xff]  }
  0x41   :  { %735 = vmatprep.subr.bf16.mxu0 %v925_v0  ;;  %317 = vmatpush1.bf16.msra.mxu1 %v796_v12  ;;  %v818_v43 = vld [vmem:[#allocation4 + $0x30] sm:$0xff]   ;;  %v819_v44 = vld [vmem:[#allocation4 + $0x38] sm:$0xff]   ;;  %v820_v45 = vld [vmem:[#allocation6] ss:$8 sps:$4 sm:$0xff]  }
  0x42   :  { %318 = vmatprep.subr.bf16.mxu1 %v797_v13  ;;  %v822_v46 = vld [vmem:[#allocation6 + $0x4] ss:$8 sps:$4 sm:$0xff]   ;;  %v825_v47 = vld [vmem:[#allocation6 + $0x14] ss:$8 sps:$4 sm:$0xff]   ;;  %v823_v48 = vld [vmem:[#allocation6 + $0x10] ss:$8 sps:$4 sm:$0xff]  }
  0x43   :  { %v828_v49 = vld [vmem:[#allocation6 + $0x24] ss:$8 sps:$4 sm:$0xff]   ;;  %v826_v50 = vld [vmem:[#allocation6 + $0x20] ss:$8 sps:$4 sm:$0xff]   ;;  %v831_v51 = vld [vmem:[#allocation6 + $0x34] ss:$8 sps:$4 sm:$0xff]  }
  0x44   :  { %736 = vmatpush3.bf16.msra.mxu0 %v782_v4  ;;  %v829_v52 = vld [vmem:[#allocation6 + $0x30] ss:$8 sps:$4 sm:$0xff]   ;;  %v834_v53 = vld [vmem:[#allocation6 + $0x44] ss:$8 sps:$4 sm:$0xff]   ;;  %v832_v54 = vld [vmem:[#allocation6 + $0x40] ss:$8 sps:$4 sm:$0xff]  }
  0x45   :  { %737 = vmatprep.subr.bf16.mxu0 %v925_v0  ;;  %319 = vmatpush1.bf16.msra.mxu1 %v799_v14  ;;  %v837_v55 = vld [vmem:[#allocation6 + $0x54] ss:$8 sps:$4 sm:$0xff]   ;;  %v835_v56 = vld [vmem:[#allocation6 + $0x50] ss:$8 sps:$4 sm:$0xff]   ;;  %v220_v60 = vld [vmem:[%s1128_s5] sm:$0x3] }
  0x46   :  { %320 = vmatprep.subr.bf16.mxu1 %v800_v15  ;;  %v225_v62 = vrot.slane %v220_v60, %v224_v59  ;;  %v229_v63 = vrot.slane %v220_v60, %v228_v61  ;;  %v359_v12 = vld [vmem:[%s1124_s1] sm:$0xff]  ;;  %v360_v14 = vld [vmem:[%s1124_s1 + $0x8] sm:$0xff] }
  0x48   :  { %738 = vmatpush3.bf16.msra.mxu0 %v783_v10 }
  0x49   :  { %739 = vmatprep.subr.bf16.mxu0 %v925_v0  ;;  %321 = vmatpush1.bf16.msra.mxu1 %v802_v17 }
  0x4a   :  { %322 = vmatprep.subr.bf16.mxu1 %v803_v18 }
  0x4c   :  { %740 = vmatpush3.bf16.msra.mxu0 %v784_v11 }
  0x4d   :  { %741 = vmatprep.subr.bf16.mxu0 %v925_v0  ;;  %323 = vmatpush1.bf16.msra.mxu1 %v805_v20 }
  0x4e   :  { %324 = vmatprep.subr.bf16.mxu1 %v806_v22  ;;  %v838_v22 = vld [vmem:[#allocation6 + $0x60] ss:$8 sps:$4 sm:$0xff]  }
  0x50   :  { %742 = vmatpush3.bf16.msra.mxu0 %v785_v16 }
  0x51   :  { %743 = vmatprep.subr.bf16.mxu0 %v925_v0  ;;  %325 = vmatpush1.bf16.msra.mxu1 %v808_v23  ;;  %v843_v23 = vld [vmem:[#allocation6 + $0x74] ss:$8 sps:$4 sm:$0xff]  }
  0x52   :  { %326 = vmatprep.subr.bf16.mxu1 %v809_v24  ;;  %v841_v24 = vld [vmem:[#allocation6 + $0x70] ss:$8 sps:$4 sm:$0xff]  }
  0x54   :  { %744 = vmatpush3.bf16.msra.mxu0 %v786_v19 }
  0x55   :  { %749 = vmatprep.subr.bf16.mxu0 %v925_v0  ;;  %327 = vmatpush1.bf16.msra.mxu1 %v811_v25  ;;  %v686_v25 = vld [vmem:[%s1130_s7] ss:$0 sm:$0xff] }
  0x56   :  { %595 = vmatprep.subr.bf16.mxu1 %v822_v46 }
  0x57   :  { %746 = vmatmul.mubr.bf16.vlgmr.msra.gmra.mrb[0].mxu0 %v787_v21  ;;  %v840_v21 = vld [vmem:[#allocation6 + $0x64] ss:$8 sps:$4 sm:$0xff]  }
  0x58   :  { %765 = vmatprep.mubr.msk.bf16.mxu0 %vm926_vm0, %v925_v0  ;;  %750 = vmatpush3.bf16.msra.mxu0 %v812_v27 }
  0x59   :  { %751 = vmatprep.subr.bf16.mxu0 %v925_v0 }
  0x5c   :  { %752 = vmatpush3.bf16.msra.mxu0 %v813_v38 }
  0x5d   :  { %753 = vmatprep.subr.bf16.mxu0 %v925_v0 }
  0x60   :  { %754 = vmatpush3.bf16.msra.mxu0 %v814_v39 }
  0x61   :  { %755 = vmatprep.subr.bf16.mxu0 %v925_v0 }
  0x64   :  { %756 = vmatpush3.bf16.msra.mxu0 %v815_v40 }
  0x65   :  { %757 = vmatprep.subr.bf16.mxu0 %v925_v0 }
  0x68   :  { %758 = vmatpush3.bf16.msra.mxu0 %v816_v41 }
  0x69   :  { %759 = vmatprep.subr.bf16.mxu0 %v925_v0 }
  0x6c   :  { %760 = vmatpush3.bf16.msra.mxu0 %v817_v42 }
  0x6d   :  { %761 = vmatprep.subr.bf16.mxu0 %v925_v0 }
  0x70   :  { %762 = vmatpush3.bf16.msra.mxu0 %v818_v43 }
  0x71   :  { %763 = vmatprep.subr.bf16.mxu0 %v925_v0 }
  0x74   :  { %764 = vmatpush3.bf16.msra.mxu0 %v819_v44 }
 0x12a   :  { %v194_v29 = vpop.f32.mrb[0].mxu0 }
 0x12b   :  { %v195_v30 = vadd.f32 %v660_v28, %v194_v29  ;;  %v747_v31 = vpop.f32.mrb[1].mxu0 }
 0x12c   :  { %v197_v32 = vpop.f32.mrb[2].mxu0 }
 0x12d   :  { %v198_v33 = vadd.f32 %v660_v28, %v197_v32  ;;  %v748_v34 = vpop.f32.mrb[3].mxu0  ;;  %v201_v35 = vmax.f32 %v195_v30, 0.0 }
 0x12f   :  { %v202_v36 = vmax.f32 %v198_v33, 0.0 }
 0x131   :  { %v203_v37 = vpack.c.bf16 %v202_v36, %v201_v35  ;;  %v503_v35 = vld [vmem:[%s1132_s9] sm:$0x3] }
 0x132   :  { %v508_v36 = vrot.slane %v503_v35, %v224_v59 }
 0x133   :  { %345 = vmatmul.mubr.bf16.vlgmr.msra.gmra.mrb[0].mxu1 %v203_v37  ;;  %v512_v37 = vrot.slane %v503_v35, %v228_v61 }
 0x134   :  { %627 = vmatprep.mubr.bf16.mxu1 %v927_v26  ;;  %596 = vmatpush1.bf16.msra.mxu1 %v820_v45 }
 0x135   :  { %597 = vmatprep.subr.bf16.mxu1 %v825_v47 }
 0x138   :  { %598 = vmatpush1.bf16.msra.mxu1 %v823_v48 }
 0x139   :  { %599 = vmatprep.subr.bf16.mxu1 %v828_v49 }
 0x13c   :  { %600 = vmatpush1.bf16.msra.mxu1 %v826_v50 }
 0x13d   :  { %601 = vmatprep.subr.bf16.mxu1 %v831_v51 }
 0x140   :  { %602 = vmatpush1.bf16.msra.mxu1 %v829_v52 }
 0x141   :  { %603 = vmatprep.subr.bf16.mxu1 %v834_v53 }
 0x144   :  { %604 = vmatpush1.bf16.msra.mxu1 %v832_v54 }
 0x145   :  { %605 = vmatprep.subr.bf16.mxu1 %v837_v55 }
 0x148   :  { %606 = vmatpush1.bf16.msra.mxu1 %v835_v56 }
 0x149   :  { %607 = vmatprep.subr.bf16.mxu1 %v840_v21 }
 0x14c   :  { %608 = vmatpush1.bf16.msra.mxu1 %v838_v22 }
 0x14d   :  { %609 = vmatprep.subr.bf16.mxu1 %v843_v23 }
 0x150   :  { %610 = vmatpush1.bf16.msra.mxu1 %v841_v24 }
 0x206   :  { %v346_v0 = vpop.f32.mrb[0].mxu1 }
 0x207   :  { %v347_v1 = vadd.f32 %v346_v0, %v225_v62  ;;  %v348_v2 = vpop.f32.mrb[1].mxu1 }
 0x208   :  { %v349_v3 = vadd.f32 %v348_v2, %v229_v63  ;;  %v350_v4 = vpop.f32.mrb[2].mxu1 }
 0x209   :  { %355 = vst [vmem:[%s1135_s12] sm:$0xff] %v347_v1  ;;  %v351_v5 = vadd.f32 %v350_v4, %v225_v62  ;;  %v352_v6 = vpop.f32.mrb[3].mxu1 }
 0x20a   :  { %357 = vst [vmem:[%s1136_s13] sm:$0xff] %v349_v3  ;;  %v361_v7 = vmul.f32 0.5, %v349_v3  ;;  %v353_v8 = vadd.f32 %v352_v6, %v229_v63 }
 0x20b   :  { %356 = vst [vmem:[%s1135_s12 + $0x8] sm:$0xff] %v351_v5 }
 0x20c   :  { %v363_v9 = vmul.f32 1.442695, %v361_v7  ;;  %358 = vst [vmem:[%s1136_s13 + $0x8] sm:$0xff] %v353_v8  ;;  %v362_v10 = vmul.f32 0.5, %v353_v8 }
 0x20e   :  { %844 = vpow2.f32 %v363_v9  ;;  %v365_v11 = vmul.f32 1.442695, %v362_v10 }
 0x210   :  { %846 = vpow2.f32 %v365_v11 }
 0x218   :  { %v845_v13 = vpop.eup %844 }
 0x219   :  { %v367_v15 = vmul.f32 %v845_v13, %v359_v12 }
 0x21a   :  { %v847_v16 = vpop.eup %846 }
 0x21b   :  { %v368_v17 = vmul.f32 %v847_v16, %v360_v14  ;;  %v369_v18 = vadd.f32 %v367_v15, %v347_v1 }
 0x21d   :  { %v370_v19 = vadd.f32 %v368_v17, %v351_v5 }
 0x21f   :  { %v371_v20 = vpack.c.bf16 %v370_v19, %v369_v18 }
 0x221   :  { %766 = vmatmul.mubr.bf16.vlgmr.msra.gmra.mrb[4].mxu0 %v371_v20 }
 0x2f4   :  { %v477_v26 = vpop.f32.mrb[4].mxu0 }
 0x2f5   :  { %v478_v27 = vadd.f32 %v686_v25, %v477_v26  ;;  %v767_v28 = vpop.f32.mrb[5].mxu0 }
 0x2f6   :  { %v480_v29 = vpop.f32.mrb[6].mxu0 }
 0x2f7   :  { %v481_v30 = vadd.f32 %v686_v25, %v480_v29  ;;  %v768_v31 = vpop.f32.mrb[7].mxu0  ;;  %v484_v32 = vmax.f32 %v478_v27, 0.0 }
 0x2f9   :  { %v485_v33 = vmax.f32 %v481_v30, 0.0 }
 0x2fb   :  { %v486_v34 = vpack.c.bf16 %v485_v33, %v484_v32 }
 0x2fd   :  { %628 = vmatmul.mubr.bf16.vlgmr.msra.gmra.mrb[4].mxu1 %v486_v34 }
 0x3d0   :  { %v629_v38 = vpop.f32.mrb[4].mxu1 }
 0x3d1   :  { %v630_v39 = vadd.f32 %v629_v38, %v508_v36  ;;  %v631_v40 = vpop.f32.mrb[5].mxu1 }
 0x3d2   :  { %v632_v41 = vadd.f32 %v631_v40, %v512_v37  ;;  %v633_v42 = vpop.f32.mrb[6].mxu1 }
 0x3d3   :  { %638 = vst [vmem:[%s1133_s10] sm:$0xff] %v630_v39  ;;  %v634_v43 = vadd.f32 %v633_v42, %v508_v36  ;;  %v635_v44 = vpop.f32.mrb[7].mxu1 }
 0x3d4   :  { %640 = vst [vmem:[%s1134_s11] sm:$0xff] %v632_v41  ;;  %v636_v45 = vadd.f32 %v635_v44, %v512_v37 }
 0x3d5   :  { %639 = vst [vmem:[%s1133_s10 + $0x8] sm:$0xff] %v634_v43 }
 0x3d6   :  { %641 = vst [vmem:[%s1134_s11 + $0x8] sm:$0xff] %v636_v45 }
 0x3d7   :  { %658 = vsyncpa [#allocation3], 1 }
 0x3d8   :  { %659 = vsyncpa [#allocation5], 1 }

</bundles_post_ra>
